<compile_context>
chip_gen: v6e
topology: v6e:2x2x1
jax: 0.10.0
libtpu: 0.0.40
codegen_flags: <defaults>
</compile_context>

<pallas_src>
import jax
import jax.numpy as jnp
from jax.experimental import pallas as pl
from jax.experimental.pallas import tpu as pltpu

INPUT_DIM = 784
NUM_CLASSES = 10
LANE = 128          # pad class dim to one full lane width -> unmasked stores
TB_MAX = 2048       # batch-tile rows (amortizes per-step overhead; VMEM-safe)


def _round_up(n, m):
    return ((n + m - 1) // m) * m


def _linear_kernel(x_ref, w_ref, b_ref, o_ref):
    # x_ref: [TB, 784] streamed tile (native dtype), w_ref: [784, 128] resident,
    # b_ref: [1, 128] resident, o_ref: [TB, 128].
    # Cast in-kernel (no-op if already f32); MXU accumulates in f32.
    x = x_ref[...].astype(jnp.float32)
    acc = jnp.dot(x, w_ref[...], preferred_element_type=jnp.float32)
    o_ref[...] = (acc + b_ref[...]).astype(o_ref.dtype)


def prepare_params(weight, bias):
    """One-time parameter prep (transpose + lane-pad). Cache across forward calls.

    weight: [10, 784] (PyTorch nn.Linear layout), bias: [10]
    returns w_pad [784, 128], b_pad [1, 128]
    """
    w_pad = jnp.pad(weight.astype(jnp.float32).T,
                    ((0, 0), (0, LANE - NUM_CLASSES)))          # [784, 128]
    b_pad = jnp.pad(bias.astype(jnp.float32),
                    (0, LANE - NUM_CLASSES)).reshape(1, LANE)   # [1, 128]
    return w_pad, b_pad


def softmax_regression_forward(x, w_pad, b_pad, *, tb=TB_MAX):
    """Forward pass of SoftmaxRegression (logits only).

    x:      anything that flattens to [-1, 784] (e.g. [B, 1, 28, 28]), any dtype
    w_pad:  [784, 128] from prepare_params
    b_pad:  [1, 128]   from prepare_params
    returns logits [B, 10] (float32)
    """
    x2d = x.reshape(-1, INPUT_DIM)          # native dtype; no host astype/pad
    B = x2d.shape[0]

    # Batch tile: multiple of 8 (sublane alignment), capped at tb. The ragged
    # last tile is handled by Pallas partial-block read/masked write, so no
    # host-side padding pass over x is needed.
    tile = min(tb, _round_up(B, 8))
    if B > 8 and B <= tile:
        # Ensure >=2 grid tiles so both v7x TensorCores get work (no-op v5e/v6e).
        tile = max(8, _round_up(pl.cdiv(B, 2), 8))
    grid = (pl.cdiv(B, tile),)

    out = pl.pallas_call(
        _linear_kernel,
        out_shape=jax.ShapeDtypeStruct((B, LANE), jnp.float32),
        grid_spec=pltpu.PrefetchScalarGridSpec(
            num_scalar_prefetch=0,
            grid=grid,
            in_specs=[
                pl.BlockSpec((tile, INPUT_DIM), lambda i: (i, 0)),  # x: streamed
                pl.BlockSpec((INPUT_DIM, LANE), lambda i: (0, 0)),  # W: resident
                pl.BlockSpec((1, LANE), lambda i: (0, 0)),          # b: resident
            ],
            out_specs=pl.BlockSpec((tile, LANE), lambda i: (i, 0)),
        ),
        compiler_params=pltpu.CompilerParams(
            dimension_semantics=("parallel",),
        ),
    )(x2d, w_pad, b_pad)

    return out[:, :NUM_CLASSES]


def _init_params(key, input_dim=INPUT_DIM, num_classes=NUM_CLASSES):
    # Deterministic init mimicking nn.Linear's uniform(-1/sqrt(fan_in), 1/sqrt(fan_in)).
    kw, kb = jax.random.split(key)
    bound = 1.0 / jnp.sqrt(jnp.float32(input_dim))
    weight = jax.random.uniform(kw, (num_classes, input_dim), jnp.float32,
                                minval=-bound, maxval=bound)
    bias = jax.random.uniform(kb, (num_classes,), jnp.float32,
                              minval=-bound, maxval=bound)
    return weight, bias


if __name__ == "__main__":
    key = jax.random.PRNGKey(0)
    k_x, k_p = jax.random.split(key)

    # Small deterministic example input: batch=2 FashionMNIST-shaped images.
    x = jax.random.normal(k_x, (2, 1, 28, 28), dtype=jnp.float32)
    weight, bias = _init_params(k_p)
    w_pad, b_pad = prepare_params(weight, bias)   # hoisted out of the hot path

    logits = softmax_regression_forward(x, w_pad, b_pad)
    jax.block_until_ready(logits)

    # Sanity check against plain-JAX reference.
    ref = x.reshape(-1, INPUT_DIM) @ weight.T + bias
    assert logits.shape == (2, NUM_CLASSES)
    assert jnp.allclose(logits, ref, atol=1e-5, rtol=1e-5)

    # Batch that spans multiple tiles with a ragged last tile (no host-side pad).
    x_big = jax.random.normal(k_x, (2050, 1, 28, 28), dtype=jnp.float32)
    logits_big = softmax_regression_forward(x_big, w_pad, b_pad)
    jax.block_until_ready(logits_big)
    ref_big = x_big.reshape(-1, INPUT_DIM) @ weight.T + bias
    assert logits_big.shape == (2050, NUM_CLASSES)
    assert jnp.allclose(logits_big, ref_big, atol=1e-4, rtol=1e-4)

    print("KERNEL_OK")
</pallas_src>

<mosaic_0001>
module attributes {stable_mosaic.version = 11 : i64} {
  func.func @_linear_kernel(%arg0: i32, %arg1: memref<8x784xf32, #tpu.memory_space<vmem>>, %arg2: memref<784x128xf32, #tpu.memory_space<vmem>>, %arg3: memref<1x128xf32, #tpu.memory_space<vmem>>, %arg4: memref<8x128xf32, #tpu.memory_space<vmem>>) attributes {dimension_semantics = [#tpu.dimension_semantics<parallel>], iteration_bounds = array<i64: 1>, scalar_prefetch = 0 : i64, scratch_operands = 0 : i64, tpu.core_type = #tpu.core_type<tc>, window_params = [{transform_indices = @transform_0, window_bounds = array<i64: 8, 784>}, {pipeline_mode = #tpu.pipeline_mode<synchronous>, transform_indices = @transform_1, window_bounds = array<i64: 784, 128>}, {pipeline_mode = #tpu.pipeline_mode<synchronous>, transform_indices = @transform_2, window_bounds = array<i64: 1, 128>}, {transform_indices = @transform_3, window_bounds = array<i64: 8, 128>}]} {
    %c0 = arith.constant 0 : index
    %c0_0 = arith.constant 0 : index
    %0 = vector.load %arg1[%c0, %c0_0] : memref<8x784xf32, #tpu.memory_space<vmem>>, vector<8x784xf32>
    %c0_1 = arith.constant 0 : index
    %c0_2 = arith.constant 0 : index
    %1 = vector.load %arg2[%c0_1, %c0_2] : memref<784x128xf32, #tpu.memory_space<vmem>>, vector<784x128xf32>
    %cst = arith.constant dense<0.000000e+00> : vector<8x128xf32>
    %2 = tpu.matmul %0, %1, %cst {dimension_numbers = #tpu.dot_dimension_numbers<[1], [0], [0], [1], [0, 0, 1, 1], [], []>} : vector<8x784xf32>, vector<784x128xf32>, vector<8x128xf32> -> vector<8x128xf32>
    %c0_3 = arith.constant 0 : index
    %c0_4 = arith.constant 0 : index
    %3 = vector.load %arg3[%c0_3, %c0_4] : memref<1x128xf32, #tpu.memory_space<vmem>>, vector<1x128xf32>
    %4 = vector.broadcast %3 : vector<1x128xf32> to vector<8x128xf32>
    %5 = arith.addf %2, %4 : vector<8x128xf32>
    %c0_5 = arith.constant 0 : index
    %c0_6 = arith.constant 0 : index
    %6 = vector.load %arg4[%c0_5, %c0_6] : memref<8x128xf32, #tpu.memory_space<vmem>>, vector<8x128xf32>
    tpu.vector_store %arg4[%c0_5, %c0_6], %5 {strides = array<i32>} : memref<8x128xf32, #tpu.memory_space<vmem>>, vector<8x128xf32>,
    return
  }
  func.func @transform_0(%arg0: i32) -> (i32, i32) {
    %c0_i32 = arith.constant 0 : i32
    %c0_i32_0 = arith.constant 0 : i32
    return %arg0, %c0_i32 : i32, i32
  }
  func.func @transform_1(%arg0: i32) -> (i32, i32) {
    %c0_i32 = arith.constant 0 : i32
    %c0_i32_0 = arith.constant 0 : i32
    %c0_i32_1 = arith.constant 0 : i32
    return %c0_i32, %c0_i32_0 : i32, i32
  }
  func.func @transform_2(%arg0: i32) -> (i32, i32) {
    %c0_i32 = arith.constant 0 : i32
    %c0_i32_0 = arith.constant 0 : i32
    %c0_i32_1 = arith.constant 0 : i32
    return %c0_i32, %c0_i32_0 : i32, i32
  }
  func.func @transform_3(%arg0: i32) -> (i32, i32) {
    %c0_i32 = arith.constant 0 : i32
    %c0_i32_0 = arith.constant 0 : i32
    return %arg0, %c0_i32 : i32, i32
  }
}

</mosaic_0001>

<bundles_post_ra>
// kernel: tpu_custom_call.1
= control target key start
LH: loop header
LB: loop body
LE: loop exit
PB: predicated region body
PF: predicated region fallthrough
CT: control target
= control target key end

     0   :  { %8 = vsyncpa [#allocation3], 0  ;;  %s808_s0 = inlined_call_operand.hbm [shape: f32[2,784], index: 0, kind: input, shape index: {}]   ;;  %s809_s1 = inlined_call_operand.hbm [shape: f32[784,128], index: 1, kind: input, shape index: {}]   ;;  %s810_s2 = inlined_call_operand.vmem [shape: f32[1,128], index: 2, kind: input, shape index: {}]   ;;  %s811_s3 = inlined_call_operand.hbm [shape: f32[2,128], index: 3, kind: output, shape index: {}]  }
   0x1   :  { %9 = vsyncpa [#allocation6], 0 }
   0x2   :  { %10 = vsyncpa [#allocation4], 0 }
   0x3   :  { %15 = vsyncadd [#allocation3], 672  ;;  %s750_s12 = smov [#allocation2]  }
   0x4   :  { %s16_s13 = sshll.u32 %s750_s12, 4  ;;  %s17_s13 = int_to_ptr.vmem [resolvable:$true] %s16_s13 }
   0x5   :  { %s692_s14 = scalar_lea.vmem %s17_s13, 224  ;;  %s696_s15 = scalar_lea.vmem %s17_s13, 896 }
   0x6   :  { %p693_p0 = scmp.ne.s32.totalorder %s17_s13, %s692_s14  ;;  %p697_p1 = scmp.lt.s32.totalorder %s17_s13, %s17_s13 }
   0x7   :  { %p698_p2 = scmp.lt.s32.totalorder %s696_s15, %s692_s14 }
   0x9   :  { %p699_p3 = por %p698_p2, %p697_p1 }
   0xb   :  { %p700_p4 = pnand %p699_p3, %p693_p0 }
   0xd   :  { %703 = shalt.err (!%p700_p4)
}
   0xe   :  { %s751_s16 = smov 224   ;;  %s752_s17 = smov 14  }
   0xf   :  { %22 = dma.hbm_to_vmem [thread:$0]  %s808_s0, 224, %s17_s13, [#allocation3], %s751_s16, %s751_s16, %s752_s17  }
  0x10   :  { %s753_s20 = smov [#allocation5]  }
  0x11   :  { %s28_s21 = sshll.u32 %s753_s20, 4  ;;  %s29_s21 = int_to_ptr.vmem [resolvable:$true] %s28_s21 }
  0x12   :  { %s712_s22 = scalar_lea.vmem %s29_s21, 12544  ;;  %p717_p6 = scmp.lt.s32.totalorder %s29_s21, %s29_s21 }
  0x13   :  { %p713_p5 = scmp.ne.s32.totalorder %s29_s21, %s712_s22  ;;  %p718_p7 = scmp.lt.s32.totalorder %s712_s22, %s712_s22 }
  0x15   :  { %p719_p8 = por %p718_p7, %p717_p6 }
  0x17   :  { %p720_p9 = pnand %p719_p8, %p713_p5 }
  0x19   :  { %723 = shalt.err (!%p720_p9)
}
  0x1a   :  { %s754_s23 = smov 128   ;;  %s755_s24 = smov 8  }
  0x1b   :  { %34 = dma.hbm_to_vmem [thread:$0]  %s809_s1, 12544, %s29_s21, [#allocation6], %s754_s23, %s754_s23, %s755_s24  }
  0x1c   :  { %744 = dma.done.wait [#allocation3], 896  }
  0x1d   :  { %745 = vsyncadd [#allocation3], 4294966400 }
  0x1e   :  { %746 = dma.done.wait [#allocation6], 12544  }
  0x1f   :  { %747 = vsyncadd [#allocation6], 4294954752  ;;  %v82_v0 = vld [vmem:[#allocation5 + $0xf8] sm:$0xff]  ;;  %v81_v2 = vld [vmem:[#allocation5 + $0xf0] sm:$0xff]  ;;  %v756_v27 = vmov 1983009808   ;;  %v171_v29 = vlaneseq }
  0x20   :  { %v66_v1 = vld [vmem:[#allocation5 + $0x78] sm:$0xff]  ;;  %545 = vmatprep.subr.mxu0 %v82_v0  ;;  %v65_v4 = vld [vmem:[#allocation5 + $0x70] sm:$0xff]  ;;  %v80_v6 = vld [vmem:[#allocation5 + $0xe8] sm:$0xff]  ;;  %v169_v28 = vunpack.c.l.s4 %v756_v27  ;;  %vm758_vm0 = vmmov 0   ;;  %vm241_vm1 = vcmask 130048  }
  0x21   :  { %v114_v3 = vld [vmem:[#allocation5 + $0x1f8] sm:$0xff]  ;;  %546 = vmatpush3.msra.mxu0 %v66_v1  ;;  %v113_v7 = vld [vmem:[#allocation5 + $0x1f0] sm:$0xff]  ;;  %v64_v8 = vld [vmem:[#allocation5 + $0x68] sm:$0xff]  ;;  %v172_v39 = vshrl.u32 %v171_v29, 7 }
  0x22   :  { %v98_v5 = vld [vmem:[#allocation5 + $0x178] sm:$0xff]  ;;  %580 = vmatprep.subr.mxu1 %v114_v3  ;;  %547 = vmatprep.subr.mxu0 %v81_v2  ;;  %v97_v9 = vld [vmem:[#allocation5 + $0x170] sm:$0xff]  ;;  %v112_v10 = vld [vmem:[#allocation5 + $0x1e8] sm:$0xff]  ;;  %v170_v38 = vunpack.c.0.s8 %v169_v28 }
  0x23   :  { %581 = vmatpush3.msra.mxu1 %v98_v5  ;;  %548 = vmatpush3.msra.mxu0 %v65_v4  ;;  %v79_v11 = vld [vmem:[#allocation5 + $0xe0] sm:$0xff]  ;;  %v96_v12 = vld [vmem:[#allocation5 + $0x168] sm:$0xff]  ;;  %v78_v15 = vld [vmem:[#allocation5 + $0xd8] sm:$0xff] }
  0x24   :  { %582 = vmatprep.subr.mxu1 %v113_v7  ;;  %549 = vmatprep.subr.mxu0 %v80_v6  ;;  %v63_v13 = vld [vmem:[#allocation5 + $0x60] sm:$0xff]  ;;  %v62_v17 = vld [vmem:[#allocation5 + $0x58] sm:$0xff]  ;;  %v77_v19 = vld [vmem:[#allocation5 + $0xd0] sm:$0xff]  ;;  %v788_v51 = vsub.s32 %v170_v38, %v172_v39 }
  0x25   :  { %583 = vmatpush3.msra.mxu1 %v97_v9  ;;  %v111_v14 = vld [vmem:[#allocation5 + $0x1e0] sm:$0xff]  ;;  %550 = vmatpush3.msra.mxu0 %v64_v8  ;;  %v110_v18 = vld [vmem:[#allocation5 + $0x1d8] sm:$0xff]  ;;  %v61_v21 = vld [vmem:[#allocation5 + $0x50] sm:$0xff] }
  0x26   :  { %584 = vmatprep.subr.mxu1 %v112_v10  ;;  %v95_v16 = vld [vmem:[#allocation5 + $0x160] sm:$0xff]  ;;  %551 = vmatprep.subr.mxu0 %v79_v11  ;;  %v94_v20 = vld [vmem:[#allocation5 + $0x158] sm:$0xff]  ;;  %v109_v22 = vld [vmem:[#allocation5 + $0x1d0] sm:$0xff] }
  0x27   :  { %585 = vmatpush3.msra.mxu1 %v96_v12  ;;  %552 = vmatpush3.msra.mxu0 %v63_v13  ;;  %v76_v23 = vld [vmem:[#allocation5 + $0xc8] sm:$0xff]  ;;  %v93_v24 = vld [vmem:[#allocation5 + $0x150] sm:$0xff]  ;;  %v75_v30 = vld [vmem:[#allocation5 + $0xc0] sm:$0xff] }
  0x28   :  { %586 = vmatprep.subr.mxu1 %v111_v14  ;;  %553 = vmatprep.subr.mxu0 %v78_v15  ;;  %v60_v25 = vld [vmem:[#allocation5 + $0x48] sm:$0xff]  ;;  %v59_v32 = vld [vmem:[#allocation5 + $0x40] sm:$0xff]  ;;  %v74_v34 = vld [vmem:[#allocation5 + $0xb8] sm:$0xff] }
  0x29   :  { %587 = vmatpush3.msra.mxu1 %v95_v16  ;;  %554 = vmatpush3.msra.mxu0 %v62_v17  ;;  %v108_v26 = vld [vmem:[#allocation5 + $0x1c8] sm:$0xff]  ;;  %v107_v33 = vld [vmem:[#allocation5 + $0x1c0] sm:$0xff]  ;;  %v58_v36 = vld [vmem:[#allocation5 + $0x38] sm:$0xff] }
  0x2a   :  { %588 = vmatprep.subr.mxu1 %v110_v18  ;;  %555 = vmatprep.subr.mxu0 %v77_v19  ;;  %v92_v31 = vld [vmem:[#allocation5 + $0x148] sm:$0xff]  ;;  %v91_v35 = vld [vmem:[#allocation5 + $0x140] sm:$0xff]  ;;  %v106_v37 = vld [vmem:[#allocation5 + $0x1b8] sm:$0xff] }
  0x2b   :  { %589 = vmatpush3.msra.mxu1 %v94_v20  ;;  %556 = vmatpush3.msra.mxu0 %v61_v21  ;;  %v73_v40 = vld [vmem:[#allocation5 + $0xb0] sm:$0xff]  ;;  %v90_v41 = vld [vmem:[#allocation5 + $0x138] sm:$0xff]  ;;  %v72_v43 = vld [vmem:[#allocation5 + $0xa8] sm:$0xff] }
  0x2c   :  { %590 = vmatprep.subr.mxu1 %v109_v22  ;;  %557 = vmatprep.subr.mxu0 %v76_v23  ;;  %v57_v42 = vld [vmem:[#allocation5 + $0x30] sm:$0xff]  ;;  %v56_v45 = vld [vmem:[#allocation5 + $0x28] sm:$0xff]  ;;  %v71_v47 = vld [vmem:[#allocation5 + $0xa0] sm:$0xff] }
  0x2d   :  { %591 = vmatpush3.msra.mxu1 %v93_v24  ;;  %558 = vmatpush3.msra.mxu0 %v60_v25  ;;  %v105_v44 = vld [vmem:[#allocation5 + $0x1b0] sm:$0xff]  ;;  %v104_v48 = vld [vmem:[#allocation5 + $0x1a8] sm:$0xff]  ;;  %v55_v49 = vld [vmem:[#allocation5 + $0x20] sm:$0xff] }
  0x2e   :  { %592 = vmatprep.subr.mxu1 %v108_v26  ;;  %559 = vmatprep.subr.mxu0 %v75_v30  ;;  %v89_v46 = vld [vmem:[#allocation5 + $0x130] sm:$0xff]  ;;  %v88_v50 = vld [vmem:[#allocation5 + $0x128] sm:$0xff]  ;;  %v103_v52 = vld [vmem:[#allocation5 + $0x1a0] sm:$0xff]  ;;  %v757_v30 = vmov 0.0  }
  0x2f   :  { %593 = vmatpush3.msra.mxu1 %v92_v31  ;;  %560 = vmatpush3.msra.mxu0 %v59_v32  ;;  %v672_v53 = vld [vmem:[#allocation2] ss:$14 sps:$4 sm:$0xff]   ;;  %v87_v55 = vld [vmem:[#allocation5 + $0x120] sm:$0xff]  ;;  %v676_v60 = vld [vmem:[#allocation2 + $0x4] ss:$14 sps:$4 sm:$0xff]  }
  0x30   :  { %594 = vmatprep.subr.mxu1 %v107_v33  ;;  %561 = vmatprep.subr.mxu0 %v74_v34  ;;  %v70_v54 = vld [vmem:[#allocation5 + $0x98] sm:$0xff]  ;;  %v674_v56 = vld [vmem:[#allocation2 + $0x1c] ss:$14 sps:$4 sm:$0xff]   ;;  %v174_v59 = vrot.slane %v672_v53, %v788_v51  ;;  %v68_v3 = vld [vmem:[#allocation5 + $0x88] sm:$0xff]  ;;  %v181_v8 = vrot.slane %v676_v60, %v788_v51 }
  0x31   :  { %595 = vmatpush3.msra.mxu1 %v91_v35  ;;  %562 = vmatpush3.msra.mxu0 %v58_v36  ;;  %v54_v57 = vld [vmem:[#allocation5 + $0x18] sm:$0xff]  ;;  %v69_v61 = vld [vmem:[#allocation5 + $0x90] sm:$0xff]  ;;  %v188_v63 = vrot.slane %v674_v56, %v788_v51  ;;  %v52_v5 = vld [vmem:[#allocation5 + $0x8] sm:$0xff] }
  0x32   :  { %596 = vmatprep.subr.mxu1 %v106_v37  ;;  %563 = vmatprep.subr.mxu0 %v73_v40  ;;  %v102_v58 = vld [vmem:[#allocation5 + $0x198] sm:$0xff]  ;;  %v53_v1 = vld [vmem:[#allocation5 + $0x10] sm:$0xff]  ;;  %v100_v6 = vld [vmem:[#allocation5 + $0x188] sm:$0xff] }
  0x33   :  { %597 = vmatpush3.msra.mxu1 %v90_v41  ;;  %564 = vmatpush3.msra.mxu0 %v57_v42  ;;  %v86_v62 = vld [vmem:[#allocation5 + $0x118] sm:$0xff]  ;;  %v101_v2 = vld [vmem:[#allocation5 + $0x190] sm:$0xff]  ;;  %v197_v7 = vcombine.high %v174_v59, %v188_v63  ;;  %v67_v10 = vld [vmem:[#allocation5 + $0x80] sm:$0xff]  ;;  %v196_v13 = vcombine.low %v174_v59, %v188_v63 }
  0x34   :  { %598 = vmatprep.subr.mxu1 %v105_v44  ;;  %565 = vmatprep.subr.mxu0 %v72_v43  ;;  %v677_v0 = vld [vmem:[#allocation2 + $0x20] ss:$14 sps:$4 sm:$0xff]   ;;  %v51_v11 = vld [vmem:[#allocation5] sm:$0xff]  ;;  %v681_v28 = vld [vmem:[#allocation2 + $0x24] ss:$14 sps:$4 sm:$0xff]  }
  0x35   :  { %599 = vmatpush3.msra.mxu1 %v89_v46  ;;  %566 = vmatpush3.msra.mxu0 %v56_v45  ;;  %v85_v4 = vld [vmem:[#allocation5 + $0x110] sm:$0xff]  ;;  %v195_v9 = vrot.slane %v677_v0, %v788_v51  ;;  %v84_v12 = vld [vmem:[#allocation5 + $0x108] sm:$0xff]  ;;  %v99_v14 = vld [vmem:[#allocation5 + $0x180] sm:$0xff]  ;;  %v224_v36 = vrot.slane %v681_v28, %v788_v51 }
  0x36   :  { %600 = vmatprep.subr.mxu1 %v104_v48  ;;  %567 = vmatprep.subr.mxu0 %v71_v47  ;;  %v146_v15 = vld [vmem:[#allocation5 + $0x2f8] sm:$0xff]  ;;  %v83_v16 = vld [vmem:[#allocation5 + $0x100] sm:$0xff]  ;;  %v145_v20 = vld [vmem:[#allocation5 + $0x2f0] sm:$0xff] }
  0x37   :  { %601 = vmatpush3.msra.mxu1 %v88_v50  ;;  %568 = vmatpush3.msra.mxu0 %v55_v49  ;;  %v199_v17 = vcombine.high %v181_v8, %v195_v9  ;;  %v130_v18 = vld [vmem:[#allocation5 + $0x278] sm:$0xff]  ;;  %v198_v19 = vcombine.low %v181_v8, %v195_v9  ;;  %v129_v21 = vld [vmem:[#allocation5 + $0x270] sm:$0xff]  ;;  %v144_v22 = vld [vmem:[#allocation5 + $0x2e8] sm:$0xff] }
  0x38   :  { %602 = vmatprep.subr.mxu1 %v103_v52  ;;  %569 = vmatprep.subr.mxu0 %v70_v54  ;;  %v128_v23 = vld [vmem:[#allocation5 + $0x268] sm:$0xff]  ;;  %v143_v24 = vld [vmem:[#allocation5 + $0x2e0] sm:$0xff]  ;;  %v683_v29 = vld [vmem:[#allocation2 + $0x28] ss:$14 sps:$4 sm:$0x33]  }
  0x39   :  { %603 = vmatpush3.msra.mxu1 %v87_v55  ;;  %570 = vmatpush3.msra.mxu0 %v54_v57  ;;  %v678_v25 = vld [vmem:[#allocation2 + $0x8] ss:$14 sps:$4 sm:$0xff]   ;;  %v680_v26 = vld [vmem:[#allocation2 + $0xc] ss:$14 sps:$4 sm:$0x33]   ;;  %v148_v27 = vld [vmem:[#allocation5 + $0x308] sm:$0xff]  ;;  %v231_v37 = vrot.slane %v683_v29, %v788_v51 }
  0x3a   :  { %604 = vmatprep.subr.mxu1 %v102_v58  ;;  %571 = vmatprep.subr.mxu0 %v69_v61  ;;  %v147_v31 = vld [vmem:[#allocation5 + $0x300] sm:$0xff]  ;;  %v795_v33 = vrot.slane %v678_v25, %v788_v51  ;;  %v217_v34 = vrot.slane %v680_v26, %v788_v51  ;;  %v142_v35 = vld [vmem:[#allocation5 + $0x2d8] sm:$0xff]  ;;  %v141_v39 = vld [vmem:[#allocation5 + $0x2d0] sm:$0xff] }
  0x3b   :  { %605 = vmatpush3.msra.mxu1 %v86_v62  ;;  %572 = vmatpush3.msra.mxu0 %v53_v1  ;;  %v127_v32 = vld [vmem:[#allocation5 + $0x260] sm:$0xff]  ;;  %v126_v38 = vld [vmem:[#allocation5 + $0x258] sm:$0xff]  ;;  %v125_v42 = vld [vmem:[#allocation5 + $0x250] sm:$0xff] }
  0x3c   :  { %606 = vmatprep.subr.mxu1 %v101_v2  ;;  %573 = vmatprep.subr.mxu0 %v68_v3  ;;  %v233_v40 = vcombine.high %v795_v33, %v224_v36  ;;  %v234_v41 = vcombine.low %v217_v34, %v231_v37  ;;  %v140_v43 = vld [vmem:[#allocation5 + $0x2c8] sm:$0xff]  ;;  %v139_v45 = vld [vmem:[#allocation5 + $0x2c0] sm:$0xff]  ;;  %v138_v47 = vld [vmem:[#allocation5 + $0x2b8] sm:$0xff]  ;;  %v232_v63 = vcombine.low %v795_v33, %v224_v36 }
  0x3d   :  { %607 = vmatpush3.msra.mxu1 %v85_v4  ;;  %574 = vmatpush3.msra.mxu0 %v52_v5  ;;  %v124_v44 = vld [vmem:[#allocation5 + $0x248] sm:$0xff]  ;;  %v123_v46 = vld [vmem:[#allocation5 + $0x240] sm:$0xff]  ;;  %v122_v48 = vld [vmem:[#allocation5 + $0x238] sm:$0xff] }
  0x3e   :  { %608 = vmatprep.subr.mxu1 %v100_v6  ;;  %575 = vmatprep.subr.mxu0 %v67_v10  ;;  %v137_v49 = vld [vmem:[#allocation5 + $0x2b0] sm:$0xff]  ;;  %v136_v51 = vld [vmem:[#allocation5 + $0x2a8] sm:$0xff]  ;;  %v135_v53 = vld [vmem:[#allocation5 + $0x2a0] sm:$0xff] }
  0x3f   :  { %308 = vmatprep.mubr.f32.mxu0 %v197_v7  ;;  %576 = vmatpush3.msra.mxu0 %v51_v11  ;;  %v121_v50 = vld [vmem:[#allocation5 + $0x230] sm:$0xff]  ;;  %v120_v52 = vld [vmem:[#allocation5 + $0x228] sm:$0xff]  ;;  %v119_v54 = vld [vmem:[#allocation5 + $0x220] sm:$0xff] }
  0x40   :  { %609 = vmatpush3.msra.mxu1 %v84_v12  ;;  %309 = vmatmul.mubr.f32.vlgmr.msra.gmra.mxu0 %v196_v13  ;;  %v134_v55 = vld [vmem:[#allocation5 + $0x298] sm:$0xff]  ;;  %v133_v57 = vld [vmem:[#allocation5 + $0x290] sm:$0xff]  ;;  %v132_v59 = vld [vmem:[#allocation5 + $0x288] sm:$0xff] }
  0x41   :  { %610 = vmatprep.subr.mxu1 %v99_v14  ;;  %615 = vmatprep.subr.mxu0 %v146_v15  ;;  %v118_v56 = vld [vmem:[#allocation5 + $0x218] sm:$0xff]  ;;  %v117_v58 = vld [vmem:[#allocation5 + $0x210] sm:$0xff]  ;;  %v116_v60 = vld [vmem:[#allocation5 + $0x208] sm:$0xff] }
  0x42   :  { %611 = vmatpush3.msra.mxu1 %v83_v16  ;;  %378 = vmatprep.mubr.f32.mxu1 %v199_v17  ;;  %v131_v61 = vld [vmem:[#allocation5 + $0x280] sm:$0xff]  ;;  %v543_v7 = vld [vmem:[%s810_s2] ss:$0 sm:$0xff] }
  0x43   :  { %616 = vmatpush3.msra.mxu0 %v130_v18  ;;  %379 = vmatmul.mubr.f32.vlgmr.msra.gmra.mxu1 %v198_v19  ;;  %v115_v62 = vld [vmem:[#allocation5 + $0x200] sm:$0xff] }
  0x44   :  { %617 = vmatprep.subr.mxu0 %v145_v20  ;;  %653 = vmatprep.subr.mxu1 %v757_v30 }
  0x45   :  { %618 = vmatpush3.msra.mxu0 %v129_v21  ;;  %654 = vmatpush3.msra.mxu1 %v148_v27 }
  0x46   :  { %619 = vmatprep.subr.mxu0 %v144_v22  ;;  %655 = vmatprep.subr.mxu1 %v757_v30 }
  0x47   :  { %620 = vmatpush3.msra.mxu0 %v128_v23  ;;  %656 = vmatpush3.msra.mxu1 %v147_v31 }
  0x48   :  { %621 = vmatprep.subr.mxu0 %v143_v24  ;;  %657 = vmatprep.mubr.msk.f32.mxu1 %vm758_vm0, %v757_v30 }
  0x49   :  { %622 = vmatpush3.msra.mxu0 %v127_v32  ;;  %448 = vmatprep.mubr.f32.mxu0 %v233_v40 }
  0x4a   :  { %623 = vmatprep.subr.mxu0 %v142_v35  ;;  %658 = vmatmul.mubr.msk.f32.vlgmr.msra.gmra.mxu1 %vm241_vm1, %v234_v41 }
  0x4b   :  { %624 = vmatpush3.msra.mxu0 %v126_v38 }
  0x4c   :  { %625 = vmatprep.subr.mxu0 %v141_v39 }
  0x4d   :  { %626 = vmatpush3.msra.mxu0 %v125_v42 }
  0x4e   :  { %627 = vmatprep.subr.mxu0 %v140_v43 }
  0x4f   :  { %628 = vmatpush3.msra.mxu0 %v124_v44 }
  0x50   :  { %629 = vmatprep.subr.mxu0 %v139_v45 }
  0x51   :  { %630 = vmatpush3.msra.mxu0 %v123_v46 }
  0x52   :  { %631 = vmatprep.subr.mxu0 %v138_v47 }
  0x53   :  { %632 = vmatpush3.msra.mxu0 %v122_v48 }
  0x54   :  { %633 = vmatprep.subr.mxu0 %v137_v49 }
  0x55   :  { %634 = vmatpush3.msra.mxu0 %v121_v50 }
  0x56   :  { %635 = vmatprep.subr.mxu0 %v136_v51 }
  0x57   :  { %636 = vmatpush3.msra.mxu0 %v120_v52 }
  0x58   :  { %637 = vmatprep.subr.mxu0 %v135_v53 }
  0x59   :  { %638 = vmatpush3.msra.mxu0 %v119_v54 }
  0x5a   :  { %639 = vmatprep.subr.mxu0 %v134_v55 }
  0x5b   :  { %640 = vmatpush3.msra.mxu0 %v118_v56 }
  0x5c   :  { %641 = vmatprep.subr.mxu0 %v133_v57 }
  0x5d   :  { %642 = vmatpush3.msra.mxu0 %v117_v58 }
  0x5e   :  { %643 = vmatprep.subr.mxu0 %v132_v59 }
  0x5f   :  { %644 = vmatpush3.msra.mxu0 %v116_v60 }
  0x60   :  { %645 = vmatprep.subr.mxu0 %v131_v61 }
  0x61   :  { %646 = vmatpush3.msra.mxu0 %v115_v62 }
  0x62   :  { %449 = vmatmul.mubr.f32.vlgmr.msra.gmra.mxu0 %v232_v63 }
 0x100   :  { %v577_v4 = vpop.f32.mrf.mxu0 }
 0x102   :  { %v578_v5 = vpop.f32.mrf.mxu0 }
 0x103   :  { %v612_v0 = vpop.f32.mrf.mxu1  ;;  %v579_v6 = vadd.f32 %v578_v5, %v577_v4 }
 0x105   :  { %v613_v1 = vpop.f32.mrf.mxu1  ;;  %v311_v8 = vadd.f32 %v579_v6, %v543_v7 }
 0x106   :  { %v614_v9 = vadd.f32 %v613_v1, %v612_v0 }
 0x108   :  { %v381_v12 = vadd.f32 %v614_v9, %v311_v8 }
 0x10a   :  { %v520_v2 = vpop.f32.mrf.mxu1 }
 0x10c   :  { %v659_v3 = vpop.f32.mrf.mxu1 }
 0x122   :  { %v647_v10 = vpop.f32.mrf.mxu0 }
 0x124   :  { %v648_v11 = vpop.f32.mrf.mxu0 }
 0x125   :  { %v649_v13 = vadd.f32 %v648_v11, %v647_v10 }
 0x127   :  { %v451_v14 = vadd.f32 %v649_v13, %v381_v12 }
 0x129   :  { %v521_v15 = vadd.f32 %v520_v2, %v451_v14 }
 0x12b   :  { %524 = vst [vmem:[#allocation7] sm:$0xff] %v521_v15 }
 0x12c   :  { %529 = vsyncadd [#allocation4], 96  ;;  %s759_s27 = smov [#allocation7]  }
 0x12d   :  { %s530_s28 = sshll.u32 %s759_s27, 4  ;;  %s531_s28 = int_to_ptr.vmem [resolvable:$true] %s530_s28 }
 0x12e   :  { %s724_s29 = scalar_lea.vmem %s531_s28, 32  ;;  %s728_s30 = scalar_lea.vmem %s531_s28, 128 }
 0x12f   :  { %p725_p10 = scmp.ne.s32.totalorder %s531_s28, %s724_s29  ;;  %p729_p11 = scmp.lt.s32.totalorder %s531_s28, %s531_s28 }
 0x130   :  { %p730_p12 = scmp.lt.s32.totalorder %s728_s30, %s724_s29 }
 0x132   :  { %p731_p13 = por %p730_p12, %p729_p11 }
 0x134   :  { %p732_p0 = pnand %p731_p13, %p725_p10 }
 0x136   :  { %735 = shalt.err (!%p732_p0)
}
 0x137   :  { %s760_s2 = smov 32   ;;  %s761_s4 = smov 2  }
 0x138   :  { %536 = dma.vmem_to_hbm [thread:$0]  %s531_s28, 32, %s811_s3, [#allocation4], %s760_s2, %s760_s2, %s761_s4  }
 0x139   :  { %748 = dma.done.wait [#allocation4], 128  }
 0x13a   :  { %749 = vsyncadd [#allocation4], 4294967168 }
 0x13b   :  { %540 = vsyncpa [#allocation3], 1 }
 0x13c   :  { %541 = vsyncpa [#allocation6], 1 }
 0x13d   :  { %542 = vsyncpa [#allocation4], 1 }

</bundles_post_ra>
